<compile_context>
chip_gen: v7x
topology: tpu7x:2x2x1
jax: 0.10.0
libtpu: 0.0.40
codegen_flags: <defaults>
</compile_context>

<pallas_src>
import jax
import jax.numpy as jnp
from jax.experimental import pallas as pl
from jax.experimental.pallas import tpu as pltpu


def _make_bilstm_kernel(full_unroll: bool, fori_unroll: int = 2):
    def kernel(
        x_ref,      # (T, Bt, D)  bf16, time-major
        w_in_ref,   # (D, 8H)     bf16, [fwd | rev] input projection, gate order (i, f, o, g)
        b_in_ref,   # (1, 8H)     f32, combined b_ih + b_hh, [fwd | rev]
        whh_ref,    # (H, 4H)     bf16, forward hidden projection
        fcw_f_ref,  # (H, O)      bf16, fc rows for the forward half
        fcw_b_ref,  # (H, O)      bf16, fc rows for the reverse half
        fcb_ref,    # (1, O)      f32
        out_ref,    # (Bt, O)     f32
        gx_ref,     # (T*Bt, 4H)  f32 VMEM scratch (used by the fori path only)
    ):
        T, Bt, D = x_ref.shape
        H = whh_ref.shape[0]
        H4 = 4 * H

        # ---- One fused input projection for BOTH directions and ALL timesteps.
        x2 = x_ref[...].reshape(T * Bt, D)                       # time-major rows, bf16
        gx = (jnp.dot(x2, w_in_ref[...], preferred_element_type=jnp.float32)
              + b_in_ref[...])                                   # (T*Bt, 8H) f32

        # Reverse gates at the last input position (column half [4H:8H), row block t=T-1).
        gx_rev_last = gx[(T - 1) * Bt:, H4:]                     # (Bt, 4H) f32

        # Gate order (i, f, o, g): lanes [0, 3H) take sigmoid, [3H, 4H) take tanh.
        # Mask hoisted once (full Bt width) so jnp.where needs no per-step broadcast.
        sig_lanes = jax.lax.broadcasted_iota(jnp.int32, (Bt, H4), 1) < 3 * H

        def combine(gates, c, *, first=False):
            # Full-width transcendentals on the EUP + one lane select, instead of
            # three 32-lane sliced activations on the serial dependency chain.
            act = jnp.where(sig_lanes, jax.nn.sigmoid(gates), jnp.tanh(gates))
            i = act[:, :H]
            f = act[:, H:2 * H]
            o = act[:, 2 * H:3 * H]
            g = act[:, 3 * H:]
            ig = i * g
            c_new = ig if first else f * c + ig
            return o * jnp.tanh(c_new), c_new

        w_hh = whh_ref[...]                                      # (H, 4H) bf16

        # ---- t = 0: h == 0 and c == 0 -> skip h @ W_hh and the f*c term.
        h, c = combine(gx[:Bt, :H4], None, first=True)

        # ---- Remaining forward recurrence: only h @ W_hh is serial.
        if full_unroll:
            for t in range(1, T):
                gates = gx[t * Bt:(t + 1) * Bt, :H4] + jnp.dot(
                    h.astype(jnp.bfloat16), w_hh, preferred_element_type=jnp.float32)
                h, c = combine(gates, c)
        else:
            # Stage forward gates in VMEM scratch so the loop body slices them with a
            # dynamic, sublane-aligned pl.ds (bounds vreg live ranges at big Bt).
            gx_ref[...] = gx[:, :H4]

            def step(t, carry):
                h, c = carry
                row = pl.multiple_of(t * Bt, 8)
                gates = gx_ref[pl.ds(row, Bt), :] + jnp.dot(
                    h.astype(jnp.bfloat16), w_hh, preferred_element_type=jnp.float32)
                return combine(gates, c)

            h, c = jax.lax.fori_loop(1, T, step, (h, c), unroll=fori_unroll)

        h_fwd = h

        # ---- Reverse direction at the last input position: one cell step from zero
        #      state (the h @ W_hh_reverse term is exactly zero, so it is skipped).
        h_bwd, _ = combine(gx_rev_last, None, first=True)

        # ---- ReLU + Linear; fc weight pre-split so no in-kernel concatenation.
        out = (jnp.dot(jnp.maximum(h_fwd, 0.0).astype(jnp.bfloat16), fcw_f_ref[...],
                       preferred_element_type=jnp.float32)
               + jnp.dot(jnp.maximum(h_bwd, 0.0).astype(jnp.bfloat16), fcw_b_ref[...],
                         preferred_element_type=jnp.float32)
               + fcb_ref[...])
        out_ref[...] = out.astype(out_ref.dtype)

    return kernel


def _prep_kernel_params(params):
    """Gate-reorder (i,f,g,o)->(i,f,o,g), fuse fwd+rev input weights/biases along the
    gate axis (D, 8H), cast MXU operands to bf16, split the fc weight per direction.

    W_hh of the reverse direction is not needed (zero initial state makes its
    contribution to the last-timestep output exactly zero)."""
    H = params["whh_f"].shape[0]

    def ro(w):  # reorder the 4H axis from PyTorch (i, f, g, o) to (i, f, o, g)
        return jnp.concatenate([w[..., :2 * H], w[..., 3 * H:], w[..., 2 * H:3 * H]],
                               axis=-1)

    w_in = jnp.concatenate([ro(params["wih_f"]), ro(params["wih_b"])],
                           axis=-1).astype(jnp.bfloat16)          # (D, 8H)
    b_in = jnp.concatenate([ro(params["b_f"]), ro(params["b_b"])], axis=-1)  # (1, 8H)

    return {
        "w_in": w_in,
        "b_in": b_in,
        "whh_f": ro(params["whh_f"]).astype(jnp.bfloat16),
        "fcw_f": params["fcw"][:H].astype(jnp.bfloat16),
        "fcw_b": params["fcw"][H:].astype(jnp.bfloat16),
        "fcb":   params["fcb"],
    }


def _ceil_to(n: int, m: int) -> int:
    return -(-n // m) * m


def _batch_tiling(B: int):
    """(padded batch, batch tile).  Tiles cap at 256 rows and, for B > 16, the grid
    keeps >= 2 steps so the 'parallel' axis shards across v7x's two TensorCores."""
    B_pad = _ceil_to(B, 8)
    if B_pad <= 16:
        return B_pad, B_pad
    bt = min(256, _ceil_to(B_pad // 2, 8))
    return _ceil_to(B_pad, bt), bt


@jax.jit
def bilstm_forward(x, params):
    """x: (B, T, D) batch_first, like the PyTorch module.  Returns (B, O) float32."""
    B, T, D = x.shape
    O = params["fcw"].shape[1]
    H = params["whh_f"].shape[0]

    kp = _prep_kernel_params(params)

    B_pad, bt = _batch_tiling(B)
    grid = (B_pad // bt,)
    # Small tiles: fully unroll the recurrence (scheduler interleaves MXU/EUP/VPU
    # across steps).  Big tiles: fori_loop(unroll=2) so vregs do not spill.
    full_unroll = bt <= 32

    # Time-major bf16 input, zero-padded along batch to a multiple of the tile.
    x_tm = jnp.transpose(x.astype(jnp.bfloat16), (1, 0, 2))       # (T, B, D)
    x_tm = jnp.pad(x_tm, ((0, 0), (0, B_pad - B), (0, 0)))

    def full(a):  # whole-array-resident block (weights/biases), same block each step
        return pl.BlockSpec(a.shape, lambda i, _nd=a.ndim: (0,) * _nd)

    in_specs = [
        pl.BlockSpec((T, bt, D), lambda i: (0, i, 0)),            # x: batch-tiled
        full(kp["w_in"]), full(kp["b_in"]), full(kp["whh_f"]),
        full(kp["fcw_f"]), full(kp["fcw_b"]), full(kp["fcb"]),
    ]

    out = pl.pallas_call(
        _make_bilstm_kernel(full_unroll),
        out_shape=jax.ShapeDtypeStruct((B_pad, O), jnp.float32),
        grid=grid,
        in_specs=in_specs,
        out_specs=pl.BlockSpec((bt, O), lambda i: (i, 0)),
        scratch_shapes=[pltpu.VMEM((T * bt, 4 * H), jnp.float32)],
        compiler_params=pltpu.CompilerParams(
            dimension_semantics=("parallel",)),
    )(x_tm, kp["w_in"], kp["b_in"], kp["whh_f"],
      kp["fcw_f"], kp["fcw_b"], kp["fcb"])
    return out[:B]


def init_params(key, input_dim, hidden_dim, output_dim):
    """Deterministic synthetic init matching nn.LSTM / nn.Linear shapes.

    PyTorch stores weight_ih_l0 as (4H, D); we store the transpose (D, 4H) so the
    kernel does x @ W.  Biases b_ih and b_hh are folded into a single (1, 4H).
    Gate order here is the PyTorch order (i, f, g, o); the kernel-side reorder to
    (i, f, o, g) happens in _prep_kernel_params."""
    H, D, O = hidden_dim, input_dim, output_dim
    ks = jax.random.split(key, 10)
    s = 1.0 / jnp.sqrt(jnp.float32(H))
    u = lambda k, shape: jax.random.uniform(k, shape, jnp.float32, -s, s)
    return {
        "wih_f": u(ks[0], (D, 4 * H)),
        "whh_f": u(ks[1], (H, 4 * H)),
        "b_f":   u(ks[2], (1, 4 * H)) + u(ks[3], (1, 4 * H)),  # b_ih + b_hh
        "wih_b": u(ks[4], (D, 4 * H)),
        "whh_b": u(ks[5], (H, 4 * H)),
        "b_b":   u(ks[6], (1, 4 * H)) + u(ks[7], (1, 4 * H)),
        "fcw":   u(ks[8], (2 * H, O)),
        "fcb":   u(ks[9], (1, O)),
    }


def reference_forward(x, params):
    """Pure-JAX f32 reference replicating the PyTorch forward exactly (full reverse pass)."""
    B, T, D = x.shape
    H = params["whh_f"].shape[0]

    def cell(x_t, h, c, w_ih, w_hh, b):
        gates = x_t @ w_ih + h @ w_hh + b
        i = jax.nn.sigmoid(gates[:, 0 * H:1 * H])
        f = jax.nn.sigmoid(gates[:, 1 * H:2 * H])
        g = jnp.tanh(gates[:, 2 * H:3 * H])
        o = jax.nn.sigmoid(gates[:, 3 * H:4 * H])
        c = f * c + i * g
        return o * jnp.tanh(c), c

    h = c = jnp.zeros((B, H), jnp.float32)
    for t in range(T):
        h, c = cell(x[:, t, :], h, c, params["wih_f"], params["whh_f"], params["b_f"])
    h_fwd_last = h

    hb = cb = jnp.zeros((B, H), jnp.float32)
    rev_outs = []
    for t in range(T - 1, -1, -1):
        hb, cb = cell(x[:, t, :], hb, cb, params["wih_b"], params["whh_b"], params["b_b"])
        rev_outs.append(hb)
    h_bwd_at_last = rev_outs[0]  # corresponds to input position T-1

    last = jnp.concatenate([h_fwd_last, h_bwd_at_last], axis=-1)
    return jnp.maximum(last, 0.0) @ params["fcw"] + params["fcb"]


if __name__ == "__main__":
    B, T, D, H, O = 2, 8, 16, 32, 4  # batch, seq, input_dim, hidden_dim, output_dim

    key = jax.random.PRNGKey(0)
    kx, kp, kx2 = jax.random.split(key, 3)
    x = jax.random.normal(kx, (B, T, D), jnp.float32)
    params = init_params(kp, D, H, O)

    out = jax.block_until_ready(bilstm_forward(x, params))
    ref = reference_forward(x, params)
    assert out.shape == (B, O), out.shape
    # bf16 MXU operands with f32 accumulation -> loosened tolerance vs the f32 reference.
    assert jnp.allclose(out, ref, atol=3e-2, rtol=3e-2), (out, ref)

    # Also exercise the large-batch path: zero-padding, a multi-step "parallel" grid,
    # and the fori_loop recurrence with dynamic pl.ds gate slicing from VMEM scratch.
    B2 = 150
    x2 = jax.random.normal(kx2, (B2, T, D), jnp.float32)
    out2 = jax.block_until_ready(bilstm_forward(x2, params))
    ref2 = reference_forward(x2, params)
    assert out2.shape == (B2, O), out2.shape
    assert jnp.allclose(out2, ref2, atol=3e-2, rtol=3e-2), \
        float(jnp.max(jnp.abs(out2 - ref2)))

    print("KERNEL_OK")
</pallas_src>

<mosaic_0001>
module attributes {stable_mosaic.version = 11 : i64} {
  func.func @kernel(%arg0: i32, %arg1: memref<8x8x16xbf16, #tpu.memory_space<vmem>>, %arg2: memref<16x256xbf16, #tpu.memory_space<vmem>>, %arg3: memref<1x256xf32, #tpu.memory_space<vmem>>, %arg4: memref<32x128xbf16, #tpu.memory_space<vmem>>, %arg5: memref<32x4xbf16, #tpu.memory_space<vmem>>, %arg6: memref<32x4xbf16, #tpu.memory_space<vmem>>, %arg7: memref<1x4xf32, #tpu.memory_space<vmem>>, %arg8: memref<8x4xf32, #tpu.memory_space<vmem>>, %arg9: memref<64x128xf32, #tpu.memory_space<vmem>>) attributes {dimension_semantics = [#tpu.dimension_semantics<parallel>], iteration_bounds = array<i64: 1>, scalar_prefetch = 0 : i64, scratch_operands = 1 : i64, tpu.core_type = #tpu.core_type<tc>, window_params = [{transform_indices = @transform_0, window_bounds = array<i64: 8, 8, 16>}, {pipeline_mode = #tpu.pipeline_mode<synchronous>, transform_indices = @transform_1, window_bounds = array<i64: 16, 256>}, {pipeline_mode = #tpu.pipeline_mode<synchronous>, transform_indices = @transform_2, window_bounds = array<i64: 1, 256>}, {pipeline_mode = #tpu.pipeline_mode<synchronous>, transform_indices = @transform_3, window_bounds = array<i64: 32, 128>}, {pipeline_mode = #tpu.pipeline_mode<synchronous>, transform_indices = @transform_4, window_bounds = array<i64: 32, 4>}, {pipeline_mode = #tpu.pipeline_mode<synchronous>, transform_indices = @transform_5, window_bounds = array<i64: 32, 4>}, {pipeline_mode = #tpu.pipeline_mode<synchronous>, transform_indices = @transform_6, window_bounds = array<i64: 1, 4>}, {transform_indices = @transform_7, window_bounds = array<i64: 8, 4>}]} {
    %c0 = arith.constant 0 : index
    %c0_0 = arith.constant 0 : index
    %c0_1 = arith.constant 0 : index
    %0 = vector.load %arg1[%c0, %c0_0, %c0_1] : memref<8x8x16xbf16, #tpu.memory_space<vmem>>, vector<8x8x16xbf16>
    %1 = vector.shape_cast %0 : vector<8x8x16xbf16> to vector<64x16xbf16>
    %c0_2 = arith.constant 0 : index
    %c0_3 = arith.constant 0 : index
    %2 = vector.load %arg2[%c0_2, %c0_3] : memref<16x256xbf16, #tpu.memory_space<vmem>>, vector<16x256xbf16>
    %cst = arith.constant dense<0.000000e+00> : vector<64x256xf32>
    %3 = tpu.matmul %1, %2, %cst {dimension_numbers = #tpu.dot_dimension_numbers<[1], [0], [0], [1], [0, 0, 1, 1], [], []>} : vector<64x16xbf16>, vector<16x256xbf16>, vector<64x256xf32> -> vector<64x256xf32>
    %c0_4 = arith.constant 0 : index
    %c0_5 = arith.constant 0 : index
    %4 = vector.load %arg3[%c0_4, %c0_5] : memref<1x256xf32, #tpu.memory_space<vmem>>, vector<1x256xf32>
    %5 = vector.broadcast %4 : vector<1x256xf32> to vector<64x256xf32>
    %6 = arith.addf %3, %5 : vector<64x256xf32>
    %7 = vector.extract_strided_slice %6 {offsets = [56, 128], sizes = [8, 128], strides = [1, 1]} : vector<64x256xf32> to vector<8x128xf32>
    %8 = tpu.iota {dimensions = array<i32: 1>} : vector<8x128xi32>
    %c96_i32 = arith.constant 96 : i32
    %9 = vector.broadcast %c96_i32 : i32 to vector<8x128xi32>
    %10 = arith.cmpi slt, %8, %9 : vector<8x128xi32>
    %c0_6 = arith.constant 0 : index
    %c0_7 = arith.constant 0 : index
    %11 = vector.load %arg4[%c0_6, %c0_7] : memref<32x128xbf16, #tpu.memory_space<vmem>>, vector<32x128xbf16>
    %12 = vector.extract_strided_slice %6 {offsets = [0, 0], sizes = [8, 128], strides = [1, 1]} : vector<64x256xf32> to vector<8x128xf32>
    %13 = arith.negf %12 : vector<8x128xf32>
    %14 = math.exp %13 : vector<8x128xf32>
    %cst_8 = arith.constant 1.000000e+00 : f32
    %15 = vector.broadcast %cst_8 : f32 to vector<8x128xf32>
    %16 = arith.addf %15, %14 : vector<8x128xf32>
    %17 = arith.divf %15, %16 : vector<8x128xf32>
    %18 = math.tanh %12 : vector<8x128xf32>
    %19 = arith.select %10, %17, %18 : vector<8x128xi1>, vector<8x128xf32>
    %20 = vector.extract_strided_slice %19 {offsets = [0, 0], sizes = [8, 32], strides = [1, 1]} : vector<8x128xf32> to vector<8x32xf32>
    %21 = vector.extract_strided_slice %19 {offsets = [0, 64], sizes = [8, 32], strides = [1, 1]} : vector<8x128xf32> to vector<8x32xf32>
    %22 = vector.extract_strided_slice %19 {offsets = [0, 96], sizes = [8, 32], strides = [1, 1]} : vector<8x128xf32> to vector<8x32xf32>
    %23 = arith.mulf %20, %22 : vector<8x32xf32>
    %24 = math.tanh %23 : vector<8x32xf32>
    %25 = arith.mulf %21, %24 : vector<8x32xf32>
    %26 = vector.extract_strided_slice %6 {offsets = [8, 0], sizes = [8, 128], strides = [1, 1]} : vector<64x256xf32> to vector<8x128xf32>
    %27 = arith.truncf %25 : vector<8x32xf32> to vector<8x32xbf16>
    %cst_9 = arith.constant dense<0.000000e+00> : vector<8x128xf32>
    %28 = tpu.matmul %27, %11, %cst_9 {dimension_numbers = #tpu.dot_dimension_numbers<[1], [0], [0], [1], [0, 0, 1, 1], [], []>} : vector<8x32xbf16>, vector<32x128xbf16>, vector<8x128xf32> -> vector<8x128xf32>
    %29 = arith.addf %26, %28 : vector<8x128xf32>
    %30 = arith.negf %29 : vector<8x128xf32>
    %31 = math.exp %30 : vector<8x128xf32>
    %cst_10 = arith.constant 1.000000e+00 : f32
    %32 = vector.broadcast %cst_10 : f32 to vector<8x128xf32>
    %33 = arith.addf %32, %31 : vector<8x128xf32>
    %34 = arith.divf %32, %33 : vector<8x128xf32>
    %35 = math.tanh %29 : vector<8x128xf32>
    %36 = arith.select %10, %34, %35 : vector<8x128xi1>, vector<8x128xf32>
    %37 = vector.extract_strided_slice %36 {offsets = [0, 0], sizes = [8, 32], strides = [1, 1]} : vector<8x128xf32> to vector<8x32xf32>
    %38 = vector.extract_strided_slice %36 {offsets = [0, 32], sizes = [8, 32], strides = [1, 1]} : vector<8x128xf32> to vector<8x32xf32>
    %39 = vector.extract_strided_slice %36 {offsets = [0, 64], sizes = [8, 32], strides = [1, 1]} : vector<8x128xf32> to vector<8x32xf32>
    %40 = vector.extract_strided_slice %36 {offsets = [0, 96], sizes = [8, 32], strides = [1, 1]} : vector<8x128xf32> to vector<8x32xf32>
    %41 = arith.mulf %37, %40 : vector<8x32xf32>
    %42 = arith.mulf %38, %23 : vector<8x32xf32>
    %43 = arith.addf %42, %41 : vector<8x32xf32>
    %44 = math.tanh %43 : vector<8x32xf32>
    %45 = arith.mulf %39, %44 : vector<8x32xf32>
    %46 = vector.extract_strided_slice %6 {offsets = [16, 0], sizes = [8, 128], strides = [1, 1]} : vector<64x256xf32> to vector<8x128xf32>
    %47 = arith.truncf %45 : vector<8x32xf32> to vector<8x32xbf16>
    %cst_11 = arith.constant dense<0.000000e+00> : vector<8x128xf32>
    %48 = tpu.matmul %47, %11, %cst_11 {dimension_numbers = #tpu.dot_dimension_numbers<[1], [0], [0], [1], [0, 0, 1, 1], [], []>} : vector<8x32xbf16>, vector<32x128xbf16>, vector<8x128xf32> -> vector<8x128xf32>
    %49 = arith.addf %46, %48 : vector<8x128xf32>
    %50 = arith.negf %49 : vector<8x128xf32>
    %51 = math.exp %50 : vector<8x128xf32>
    %cst_12 = arith.constant 1.000000e+00 : f32
    %52 = vector.broadcast %cst_12 : f32 to vector<8x128xf32>
    %53 = arith.addf %52, %51 : vector<8x128xf32>
    %54 = arith.divf %52, %53 : vector<8x128xf32>
    %55 = math.tanh %49 : vector<8x128xf32>
    %56 = arith.select %10, %54, %55 : vector<8x128xi1>, vector<8x128xf32>
    %57 = vector.extract_strided_slice %56 {offsets = [0, 0], sizes = [8, 32], strides = [1, 1]} : vector<8x128xf32> to vector<8x32xf32>
    %58 = vector.extract_strided_slice %56 {offsets = [0, 32], sizes = [8, 32], strides = [1, 1]} : vector<8x128xf32> to vector<8x32xf32>
    %59 = vector.extract_strided_slice %56 {offsets = [0, 64], sizes = [8, 32], strides = [1, 1]} : vector<8x128xf32> to vector<8x32xf32>
    %60 = vector.extract_strided_slice %56 {offsets = [0, 96], sizes = [8, 32], strides = [1, 1]} : vector<8x128xf32> to vector<8x32xf32>
    %61 = arith.mulf %57, %60 : vector<8x32xf32>
    %62 = arith.mulf %58, %43 : vector<8x32xf32>
    %63 = arith.addf %62, %61 : vector<8x32xf32>
    %64 = math.tanh %63 : vector<8x32xf32>
    %65 = arith.mulf %59, %64 : vector<8x32xf32>
    %66 = vector.extract_strided_slice %6 {offsets = [24, 0], sizes = [8, 128], strides = [1, 1]} : vector<64x256xf32> to vector<8x128xf32>
    %67 = arith.truncf %65 : vector<8x32xf32> to vector<8x32xbf16>
    %cst_13 = arith.constant dense<0.000000e+00> : vector<8x128xf32>
    %68 = tpu.matmul %67, %11, %cst_13 {dimension_numbers = #tpu.dot_dimension_numbers<[1], [0], [0], [1], [0, 0, 1, 1], [], []>} : vector<8x32xbf16>, vector<32x128xbf16>, vector<8x128xf32> -> vector<8x128xf32>
    %69 = arith.addf %66, %68 : vector<8x128xf32>
    %70 = arith.negf %69 : vector<8x128xf32>
    %71 = math.exp %70 : vector<8x128xf32>
    %cst_14 = arith.constant 1.000000e+00 : f32
    %72 = vector.broadcast %cst_14 : f32 to vector<8x128xf32>
    %73 = arith.addf %72, %71 : vector<8x128xf32>
    %74 = arith.divf %72, %73 : vector<8x128xf32>
    %75 = math.tanh %69 : vector<8x128xf32>
    %76 = arith.select %10, %74, %75 : vector<8x128xi1>, vector<8x128xf32>
    %77 = vector.extract_strided_slice %76 {offsets = [0, 0], sizes = [8, 32], strides = [1, 1]} : vector<8x128xf32> to vector<8x32xf32>
    %78 = vector.extract_strided_slice %76 {offsets = [0, 32], sizes = [8, 32], strides = [1, 1]} : vector<8x128xf32> to vector<8x32xf32>
    %79 = vector.extract_strided_slice %76 {offsets = [0, 64], sizes = [8, 32], strides = [1, 1]} : vector<8x128xf32> to vector<8x32xf32>
    %80 = vector.extract_strided_slice %76 {offsets = [0, 96], sizes = [8, 32], strides = [1, 1]} : vector<8x128xf32> to vector<8x32xf32>
    %81 = arith.mulf %77, %80 : vector<8x32xf32>
    %82 = arith.mulf %78, %63 : vector<8x32xf32>
    %83 = arith.addf %82, %81 : vector<8x32xf32>
    %84 = math.tanh %83 : vector<8x32xf32>
    %85 = arith.mulf %79, %84 : vector<8x32xf32>
    %86 = vector.extract_strided_slice %6 {offsets = [32, 0], sizes = [8, 128], strides = [1, 1]} : vector<64x256xf32> to vector<8x128xf32>
    %87 = arith.truncf %85 : vector<8x32xf32> to vector<8x32xbf16>
    %cst_15 = arith.constant dense<0.000000e+00> : vector<8x128xf32>
    %88 = tpu.matmul %87, %11, %cst_15 {dimension_numbers = #tpu.dot_dimension_numbers<[1], [0], [0], [1], [0, 0, 1, 1], [], []>} : vector<8x32xbf16>, vector<32x128xbf16>, vector<8x128xf32> -> vector<8x128xf32>
    %89 = arith.addf %86, %88 : vector<8x128xf32>
    %90 = arith.negf %89 : vector<8x128xf32>
    %91 = math.exp %90 : vector<8x128xf32>
    %cst_16 = arith.constant 1.000000e+00 : f32
    %92 = vector.broadcast %cst_16 : f32 to vector<8x128xf32>
    %93 = arith.addf %92, %91 : vector<8x128xf32>
    %94 = arith.divf %92, %93 : vector<8x128xf32>
    %95 = math.tanh %89 : vector<8x128xf32>
    %96 = arith.select %10, %94, %95 : vector<8x128xi1>, vector<8x128xf32>
    %97 = vector.extract_strided_slice %96 {offsets = [0, 0], sizes = [8, 32], strides = [1, 1]} : vector<8x128xf32> to vector<8x32xf32>
    %98 = vector.extract_strided_slice %96 {offsets = [0, 32], sizes = [8, 32], strides = [1, 1]} : vector<8x128xf32> to vector<8x32xf32>
    %99 = vector.extract_strided_slice %96 {offsets = [0, 64], sizes = [8, 32], strides = [1, 1]} : vector<8x128xf32> to vector<8x32xf32>
    %100 = vector.extract_strided_slice %96 {offsets = [0, 96], sizes = [8, 32], strides = [1, 1]} : vector<8x128xf32> to vector<8x32xf32>
    %101 = arith.mulf %97, %100 : vector<8x32xf32>
    %102 = arith.mulf %98, %83 : vector<8x32xf32>
    %103 = arith.addf %102, %101 : vector<8x32xf32>
    %104 = math.tanh %103 : vector<8x32xf32>
    %105 = arith.mulf %99, %104 : vector<8x32xf32>
    %106 = vector.extract_strided_slice %6 {offsets = [40, 0], sizes = [8, 128], strides = [1, 1]} : vector<64x256xf32> to vector<8x128xf32>
    %107 = arith.truncf %105 : vector<8x32xf32> to vector<8x32xbf16>
    %cst_17 = arith.constant dense<0.000000e+00> : vector<8x128xf32>
    %108 = tpu.matmul %107, %11, %cst_17 {dimension_numbers = #tpu.dot_dimension_numbers<[1], [0], [0], [1], [0, 0, 1, 1], [], []>} : vector<8x32xbf16>, vector<32x128xbf16>, vector<8x128xf32> -> vector<8x128xf32>
    %109 = arith.addf %106, %108 : vector<8x128xf32>
    %110 = arith.negf %109 : vector<8x128xf32>
    %111 = math.exp %110 : vector<8x128xf32>
    %cst_18 = arith.constant 1.000000e+00 : f32
    %112 = vector.broadcast %cst_18 : f32 to vector<8x128xf32>
    %113 = arith.addf %112, %111 : vector<8x128xf32>
    %114 = arith.divf %112, %113 : vector<8x128xf32>
    %115 = math.tanh %109 : vector<8x128xf32>
    %116 = arith.select %10, %114, %115 : vector<8x128xi1>, vector<8x128xf32>
    %117 = vector.extract_strided_slice %116 {offsets = [0, 0], sizes = [8, 32], strides = [1, 1]} : vector<8x128xf32> to vector<8x32xf32>
    %118 = vector.extract_strided_slice %116 {offsets = [0, 32], sizes = [8, 32], strides = [1, 1]} : vector<8x128xf32> to vector<8x32xf32>
    %119 = vector.extract_strided_slice %116 {offsets = [0, 64], sizes = [8, 32], strides = [1, 1]} : vector<8x128xf32> to vector<8x32xf32>
    %120 = vector.extract_strided_slice %116 {offsets = [0, 96], sizes = [8, 32], strides = [1, 1]} : vector<8x128xf32> to vector<8x32xf32>
    %121 = arith.mulf %117, %120 : vector<8x32xf32>
    %122 = arith.mulf %118, %103 : vector<8x32xf32>
    %123 = arith.addf %122, %121 : vector<8x32xf32>
    %124 = math.tanh %123 : vector<8x32xf32>
    %125 = arith.mulf %119, %124 : vector<8x32xf32>
    %126 = vector.extract_strided_slice %6 {offsets = [48, 0], sizes = [8, 128], strides = [1, 1]} : vector<64x256xf32> to vector<8x128xf32>
    %127 = arith.truncf %125 : vector<8x32xf32> to vector<8x32xbf16>
    %cst_19 = arith.constant dense<0.000000e+00> : vector<8x128xf32>
    %128 = tpu.matmul %127, %11, %cst_19 {dimension_numbers = #tpu.dot_dimension_numbers<[1], [0], [0], [1], [0, 0, 1, 1], [], []>} : vector<8x32xbf16>, vector<32x128xbf16>, vector<8x128xf32> -> vector<8x128xf32>
    %129 = arith.addf %126, %128 : vector<8x128xf32>
    %130 = arith.negf %129 : vector<8x128xf32>
    %131 = math.exp %130 : vector<8x128xf32>
    %cst_20 = arith.constant 1.000000e+00 : f32
    %132 = vector.broadcast %cst_20 : f32 to vector<8x128xf32>
    %133 = arith.addf %132, %131 : vector<8x128xf32>
    %134 = arith.divf %132, %133 : vector<8x128xf32>
    %135 = math.tanh %129 : vector<8x128xf32>
    %136 = arith.select %10, %134, %135 : vector<8x128xi1>, vector<8x128xf32>
    %137 = vector.extract_strided_slice %136 {offsets = [0, 0], sizes = [8, 32], strides = [1, 1]} : vector<8x128xf32> to vector<8x32xf32>
    %138 = vector.extract_strided_slice %136 {offsets = [0, 32], sizes = [8, 32], strides = [1, 1]} : vector<8x128xf32> to vector<8x32xf32>
    %139 = vector.extract_strided_slice %136 {offsets = [0, 64], sizes = [8, 32], strides = [1, 1]} : vector<8x128xf32> to vector<8x32xf32>
    %140 = vector.extract_strided_slice %136 {offsets = [0, 96], sizes = [8, 32], strides = [1, 1]} : vector<8x128xf32> to vector<8x32xf32>
    %141 = arith.mulf %137, %140 : vector<8x32xf32>
    %142 = arith.mulf %138, %123 : vector<8x32xf32>
    %143 = arith.addf %142, %141 : vector<8x32xf32>
    %144 = math.tanh %143 : vector<8x32xf32>
    %145 = arith.mulf %139, %144 : vector<8x32xf32>
    %146 = vector.extract_strided_slice %6 {offsets = [56, 0], sizes = [8, 128], strides = [1, 1]} : vector<64x256xf32> to vector<8x128xf32>
    %147 = arith.truncf %145 : vector<8x32xf32> to vector<8x32xbf16>
    %cst_21 = arith.constant dense<0.000000e+00> : vector<8x128xf32>
    %148 = tpu.matmul %147, %11, %cst_21 {dimension_numbers = #tpu.dot_dimension_numbers<[1], [0], [0], [1], [0, 0, 1, 1], [], []>} : vector<8x32xbf16>, vector<32x128xbf16>, vector<8x128xf32> -> vector<8x128xf32>
    %149 = arith.addf %146, %148 : vector<8x128xf32>
    %150 = arith.negf %149 : vector<8x128xf32>
    %151 = math.exp %150 : vector<8x128xf32>
    %cst_22 = arith.constant 1.000000e+00 : f32
    %152 = vector.broadcast %cst_22 : f32 to vector<8x128xf32>
    %153 = arith.addf %152, %151 : vector<8x128xf32>
    %154 = arith.divf %152, %153 : vector<8x128xf32>
    %155 = math.tanh %149 : vector<8x128xf32>
    %156 = arith.select %10, %154, %155 : vector<8x128xi1>, vector<8x128xf32>
    %157 = vector.extract_strided_slice %156 {offsets = [0, 0], sizes = [8, 32], strides = [1, 1]} : vector<8x128xf32> to vector<8x32xf32>
    %158 = vector.extract_strided_slice %156 {offsets = [0, 32], sizes = [8, 32], strides = [1, 1]} : vector<8x128xf32> to vector<8x32xf32>
    %159 = vector.extract_strided_slice %156 {offsets = [0, 64], sizes = [8, 32], strides = [1, 1]} : vector<8x128xf32> to vector<8x32xf32>
    %160 = vector.extract_strided_slice %156 {offsets = [0, 96], sizes = [8, 32], strides = [1, 1]} : vector<8x128xf32> to vector<8x32xf32>
    %161 = arith.mulf %157, %160 : vector<8x32xf32>
    %162 = arith.mulf %158, %143 : vector<8x32xf32>
    %163 = arith.addf %162, %161 : vector<8x32xf32>
    %164 = math.tanh %163 : vector<8x32xf32>
    %165 = arith.mulf %159, %164 : vector<8x32xf32>
    %166 = arith.negf %7 : vector<8x128xf32>
    %167 = math.exp %166 : vector<8x128xf32>
    %cst_23 = arith.constant 1.000000e+00 : f32
    %168 = vector.broadcast %cst_23 : f32 to vector<8x128xf32>
    %169 = arith.addf %168, %167 : vector<8x128xf32>
    %170 = arith.divf %168, %169 : vector<8x128xf32>
    %171 = math.tanh %7 : vector<8x128xf32>
    %172 = arith.select %10, %170, %171 : vector<8x128xi1>, vector<8x128xf32>
    %173 = vector.extract_strided_slice %172 {offsets = [0, 0], sizes = [8, 32], strides = [1, 1]} : vector<8x128xf32> to vector<8x32xf32>
    %174 = vector.extract_strided_slice %172 {offsets = [0, 64], sizes = [8, 32], strides = [1, 1]} : vector<8x128xf32> to vector<8x32xf32>
    %175 = vector.extract_strided_slice %172 {offsets = [0, 96], sizes = [8, 32], strides = [1, 1]} : vector<8x128xf32> to vector<8x32xf32>
    %176 = arith.mulf %173, %175 : vector<8x32xf32>
    %177 = math.tanh %176 : vector<8x32xf32>
    %178 = arith.mulf %174, %177 : vector<8x32xf32>
    %cst_24 = arith.constant 0.000000e+00 : f32
    %179 = vector.broadcast %cst_24 : f32 to vector<8x32xf32>
    %180 = arith.maximumf %165, %179 : vector<8x32xf32>
    %181 = arith.truncf %180 : vector<8x32xf32> to vector<8x32xbf16>
    %c0_25 = arith.constant 0 : index
    %c0_26 = arith.constant 0 : index
    %182 = vector.load %arg5[%c0_25, %c0_26] : memref<32x4xbf16, #tpu.memory_space<vmem>>, vector<32x4xbf16>
    %cst_27 = arith.constant dense<0.000000e+00> : vector<8x4xf32>
    %183 = tpu.matmul %181, %182, %cst_27 {dimension_numbers = #tpu.dot_dimension_numbers<[1], [0], [0], [1], [0, 0, 1, 1], [], []>} : vector<8x32xbf16>, vector<32x4xbf16>, vector<8x4xf32> -> vector<8x4xf32>
    %cst_28 = arith.constant 0.000000e+00 : f32
    %184 = vector.broadcast %cst_28 : f32 to vector<8x32xf32>
    %185 = arith.maximumf %178, %184 : vector<8x32xf32>
    %186 = arith.truncf %185 : vector<8x32xf32> to vector<8x32xbf16>
    %c0_29 = arith.constant 0 : index
    %c0_30 = arith.constant 0 : index
    %187 = vector.load %arg6[%c0_29, %c0_30] : memref<32x4xbf16, #tpu.memory_space<vmem>>, vector<32x4xbf16>
    %cst_31 = arith.constant dense<0.000000e+00> : vector<8x4xf32>
    %188 = tpu.matmul %186, %187, %cst_31 {dimension_numbers = #tpu.dot_dimension_numbers<[1], [0], [0], [1], [0, 0, 1, 1], [], []>} : vector<8x32xbf16>, vector<32x4xbf16>, vector<8x4xf32> -> vector<8x4xf32>
    %189 = arith.addf %183, %188 : vector<8x4xf32>
    %c0_32 = arith.constant 0 : index
    %c0_33 = arith.constant 0 : index
    %190 = vector.load %arg7[%c0_32, %c0_33] : memref<1x4xf32, #tpu.memory_space<vmem>>, vector<1x4xf32>
    %191 = vector.broadcast %190 : vector<1x4xf32> to vector<8x4xf32>
    %192 = arith.addf %189, %191 : vector<8x4xf32>
    %c0_34 = arith.constant 0 : index
    %c0_35 = arith.constant 0 : index
    %193 = vector.load %arg8[%c0_34, %c0_35] : memref<8x4xf32, #tpu.memory_space<vmem>>, vector<8x4xf32>
    tpu.vector_store %arg8[%c0_34, %c0_35], %192 {strides = array<i32>} : memref<8x4xf32, #tpu.memory_space<vmem>>, vector<8x4xf32>,
    return
  }
  func.func @transform_0(%arg0: i32) -> (i32, i32, i32) {
    %c0_i32 = arith.constant 0 : i32
    %c0_i32_0 = arith.constant 0 : i32
    %c0_i32_1 = arith.constant 0 : i32
    return %c0_i32, %arg0, %c0_i32_0 : i32, i32, i32
  }
  func.func @transform_1(%arg0: i32) -> (i32, i32) {
    %c0_i32 = arith.constant 0 : i32
    %c0_i32_0 = arith.constant 0 : i32
    %c0_i32_1 = arith.constant 0 : i32
    return %c0_i32, %c0_i32_0 : i32, i32
  }
  func.func @transform_2(%arg0: i32) -> (i32, i32) {
    %c0_i32 = arith.constant 0 : i32
    %c0_i32_0 = arith.constant 0 : i32
    %c0_i32_1 = arith.constant 0 : i32
    return %c0_i32, %c0_i32_0 : i32, i32
  }
  func.func @transform_3(%arg0: i32) -> (i32, i32) {
    %c0_i32 = arith.constant 0 : i32
    %c0_i32_0 = arith.constant 0 : i32
    %c0_i32_1 = arith.constant 0 : i32
    return %c0_i32, %c0_i32_0 : i32, i32
  }
  func.func @transform_4(%arg0: i32) -> (i32, i32) {
    %c0_i32 = arith.constant 0 : i32
    %c0_i32_0 = arith.constant 0 : i32
    %c0_i32_1 = arith.constant 0 : i32
    return %c0_i32, %c0_i32_0 : i32, i32
  }
  func.func @transform_5(%arg0: i32) -> (i32, i32) {
    %c0_i32 = arith.constant 0 : i32
    %c0_i32_0 = arith.constant 0 : i32
    %c0_i32_1 = arith.constant 0 : i32
    return %c0_i32, %c0_i32_0 : i32, i32
  }
  func.func @transform_6(%arg0: i32) -> (i32, i32) {
    %c0_i32 = arith.constant 0 : i32
    %c0_i32_0 = arith.constant 0 : i32
    %c0_i32_1 = arith.constant 0 : i32
    return %c0_i32, %c0_i32_0 : i32, i32
  }
  func.func @transform_7(%arg0: i32) -> (i32, i32) {
    %c0_i32 = arith.constant 0 : i32
    %c0_i32_0 = arith.constant 0 : i32
    return %arg0, %c0_i32 : i32, i32
  }
}

</mosaic_0001>

<bundles_post_ra>
// kernel: bilstm_forward.1
= control target key start
LH: loop header
LB: loop body
LE: loop exit
PB: predicated region body
PF: predicated region fallthrough
CT: control target
= control target key end

     0   :  { %v1097_v1 = vmov 0   ;;  %vm79_vm0 = vcmask 130048   ;;  %v39_v4 = vlaneseq  ;;  %v1099_v23 = vmov 0.0   ;;  %s1101_s12 = smov 64   ;;  %s1338_s1 = inlined_call_operand.vmem [shape: bf16[16,256], index: 1, kind: input, shape index: {}]   ;;  %s1339_s0 = inlined_call_operand.vmem [shape: bf16[8,8,16], index: 0, kind: input, shape index: {}]   ;;  %s1340_s2 = inlined_call_operand.vmem [shape: f32[1,256], index: 2, kind: input, shape index: {}]   ;;  %s1341_s3 = inlined_call_operand.vmem [shape: bf16[32,128], index: 3, kind: input, shape index: {}]   ;;  %s1342_s5 = inlined_call_operand.vmem [shape: bf16[32,4], index: 5, kind: input, shape index: {}]   ;;  %s1343_s4 = inlined_call_operand.vmem [shape: bf16[32,4], index: 4, kind: input, shape index: {}]   ;;  %s1344_s6 = inlined_call_operand.vmem [shape: f32[1,4], index: 6, kind: input, shape index: {}]   ;;  %s1345_s7 = inlined_call_operand.vmem [shape: f32[8,4], index: 7, kind: output, shape index: {}]  }
   0x1   :  { %v1012_v0 = vld [vmem:[%s1338_s1 + $0x4] ss:$8 sps:$4 sm:$0xff]   ;;  %124 = vmatprep.mubr.bf16.mxu0 %v1097_v1  ;;  %v1014_v2 = vld [vmem:[%s1338_s1] ss:$8 sps:$4 sm:$0xff]   ;;  %s1098_s1 = smov 32   ;;  %935 = vmatprep.subr.bf16.mxu1 %v1099_v23  ;;  %vm1100_vm2 = vmmov 0  }
   0x2   :  { %92 = vmatprep.subr.bf16.mxu0 %v1012_v0  ;;  %v1015_v3 = vld [vmem:[%s1339_s0] sm:$0xff]   ;;  %v1154_v5 = vshrl.u32 %v39_v4, 7  ;;  %v1166_v17 = vand.u32 127, %v39_v4  ;;  %939 = vmatprep.mubr.msk.bf16.mxu1 %vm1100_vm2, %v1099_v23  ;;  %v1185_v25 = vld [vmem:[%s1341_s3 + $0x8] sm:$0xff]   ;;  %vm200_vm3 = vcmask 261120   ;;  %vm867_vm4 = vcmask 31744  }
   0x3   :  { %93 = vmatpush1.bf16.msra.mxu0 %v1014_v2  ;;  %v1160_v7 = vld [vmem:[%s1340_s2] sm:$0x3]  ;;  %v1018_v49 = vld [vmem:[%s1339_s0 + $0x8] sm:$0xff]  }
   0x4   :  { %v41_v6 = vsub.s32 0, %v1154_v5  ;;  %vm160_vm1 = vcmp.lt.s32.totalorder %v1166_v17, 96  ;;  %v1176_v24 = vld [vmem:[%s1341_s3] sm:$0xff]   ;;  %967 = vmatprep.subr.bf16.mxu0 %v1099_v23 }
   0x5   :  { %936 = vmatpush3.bf16.msra.mxu1 %v1176_v24 }
   0x6   :  { %879 = vmatmul.mubr.msk.bf16.vlgmr.msra.gmra.mrb[0].mxu0 %vm79_vm0, %v1015_v3  ;;  %v1163_v8 = vrot.slane %v1160_v7, %v41_v6  ;;  %937 = vmatprep.subr.bf16.mxu1 %v1099_v23 }
   0x7   :  { %132 = vmatprep.mubr.bf16.mxu0 %v1097_v1  ;;  %968 = vmatpush3.bf16.msra.mxu0 %v1176_v24 }
   0x8   :  { %969 = vmatprep.subr.bf16.mxu0 %v1099_v23 }
   0x9   :  { %938 = vmatpush3.bf16.msra.mxu1 %v1185_v25 }
   0xa   :  { %943 = vmatprep.subr.bf16.mxu1 %v1099_v23 }
   0xb   :  { %970 = vmatpush3.bf16.msra.mxu0 %v1185_v25 }
   0xc   :  { %983 = vmatprep.subr.bf16.mxu0 %v1099_v23 }
   0xe   :  { %880 = vmatmul.mubr.msk.bf16.gmra.mrb[4].mxu0 %vm79_vm0, %v1018_v49 }
   0xf   :  { %140 = vmatprep.mubr.bf16.mxu0 %v1097_v1 }
  0xd9   :  { %v126_v9 = vpop.f32.mrb[0].mxu0 }
  0xda   :  { %v127_v10 = vadd.f32 %v126_v9, %v1163_v8  ;;  %v128_v11 = vpop.f32.mrb[1].mxu0 }
  0xdb   :  { %v129_v12 = vpop.f32.mrb[2].mxu0 }
  0xdc   :  { %v883_v13 = vmul.f32 -1.442695, %v127_v10  ;;  %v131_v14 = vpop.f32.mrb[3].mxu0  ;;  %v130_v31 = vadd.f32 %v129_v12, %v1163_v8 }
  0xde   :  { %1025 = vpow2.f32 %v883_v13 }
  0xdf   :  { %1027 = vtanh.f32 %v127_v10 }
  0xe1   :  { %v134_v54 = vpop.f32.mrb[4].mxu0 }
  0xe2   :  { %v136_v55 = vpop.f32.mrb[5].mxu0  ;;  %v135_v59 = vadd.f32 %v134_v54, %v1163_v8 }
  0xe3   :  { %v137_v56 = vpop.f32.mrb[6].mxu0 }
  0xe4   :  { %v139_v57 = vpop.f32.mrb[7].mxu0 }
  0xe8   :  { %v1026_v15 = vpop.eup %1025 }
  0xe9   :  { %v168_v16 = vadd.f32 1.0, %v1026_v15  ;;  %v1028_v18 = vpop.eup %1027 }
  0xeb   :  { %1029 = vrcp.f32 %v168_v16 }
  0xf5   :  { %v1030_v19 = vpop.eup %1029 }
  0xf6   :  { %v172_v20 = vsel %vm160_vm1, %v1030_v19, %v1028_v18 }
  0xf7   :  { %174 = vrot.lane.b32.xlu0 %v172_v20, %s1098_s1 }
 0x169   :  { %v175_v21 = vpop.permute.xlu0 %174 }
 0x16a   :  { %v177_v22 = vmul.f32 %v175_v21, %v172_v20 }
 0x16c   :  { %1031 = vtanh.f32 %v177_v22 }
 0x176   :  { %v1032_v26 = vpop.eup %1031 }
 0x177   :  { %180 = vrot.lane.b32.xlu0 %v1032_v26, %s1101_s12 }
 0x17b   :  { %259 = vrot.lane.b32.xlu0 %v177_v22, %s1098_s1  ;;  %v138_v22 = vadd.f32 %v137_v56, %v1163_v8 }
 0x1e9   :  { %v181_v27 = vpop.permute.xlu0 %180 }
 0x1ea   :  { %v183_v28 = vmul.f32 %v181_v27, %v172_v20 }
 0x1ec   :  { %v184_v29 = vpack.c.bf16 %v183_v28, %v183_v28 }
 0x1ed   :  { %v260_v45 = vpop.permute.xlu0 %259 }
 0x1ee   :  { %186 = vrot.lane.b32.xlu1 %v184_v29, %s1101_s12 }
 0x260   :  { %v187_v30 = vpop.permute.xlu1 %186 }
 0x261   :  { %940 = vmatmul.mubr.msk.bf16.vlgmr.msra.gmra.mrb[0].mxu1 %vm200_vm3, %v187_v30 }
 0x262   :  { %944 = vmatpush3.bf16.msra.mxu1 %v1176_v24  ;;  %947 = vmatprep.mubr.msk.bf16.mxu1 %vm1100_vm2, %v1099_v23 }
 0x263   :  { %945 = vmatprep.subr.bf16.mxu1 %v1099_v23 }
 0x266   :  { %946 = vmatpush3.bf16.msra.mxu1 %v1185_v25 }
 0x267   :  { %951 = vmatprep.subr.bf16.mxu1 %v1099_v23 }
 0x334   :  { %v238_v32 = vpop.f32.mrb[0].mxu1 }
 0x335   :  { %v244_v33 = vadd.f32 %v238_v32, %v130_v31  ;;  %v941_v34 = vpop.f32.mrb[1].mxu1 }
 0x336   :  { %v241_v35 = vpop.f32.mrb[2].mxu1 }
 0x337   :  { %v887_v36 = vmul.f32 -1.442695, %v244_v33  ;;  %v942_v37 = vpop.f32.mrb[3].mxu1 }
 0x339   :  { %1033 = vpow2.f32 %v887_v36 }
 0x33a   :  { %1035 = vtanh.f32 %v244_v33 }
 0x343   :  { %v1034_v38 = vpop.eup %1033 }
 0x344   :  { %v248_v39 = vadd.f32 1.0, %v1034_v38  ;;  %v1036_v40 = vpop.eup %1035 }
 0x346   :  { %1037 = vrcp.f32 %v248_v39 }
 0x350   :  { %v1038_v41 = vpop.eup %1037 }
 0x351   :  { %v252_v42 = vsel %vm160_vm1, %v1038_v41, %v1036_v40 }
 0x352   :  { %254 = vrot.lane.b32.xlu1 %v252_v42, %s1098_s1  ;;  %v262_v46 = vmul.f32 %v260_v45, %v252_v42 }
 0x3c4   :  { %v255_v43 = vpop.permute.xlu1 %254 }
 0x3c5   :  { %v257_v44 = vmul.f32 %v255_v43, %v252_v42 }
 0x3c7   :  { %264 = vrot.lane.b32.xlu1 %v257_v44, %s1098_s1 }
 0x439   :  { %v265_v47 = vpop.permute.xlu1 %264 }
 0x43a   :  { %v267_v48 = vadd.f32 %v265_v47, %v262_v46 }
 0x43c   :  { %1039 = vtanh.f32 %v267_v48 }
 0x446   :  { %v1040_v50 = vpop.eup %1039 }
 0x447   :  { %270 = vrot.lane.b32.xlu0 %v1040_v50, %s1098_s1 }
 0x4b9   :  { %v271_v51 = vpop.permute.xlu0 %270 }
 0x4ba   :  { %v273_v52 = vmul.f32 %v271_v51, %v252_v42  ;;  %v1019_v42 = vld [vmem:[%s1339_s0 + $0x10] sm:$0xff]  }
 0x4bb   :  { %881 = vmatmul.mubr.msk.bf16.gmra.mrb[8].mxu0 %vm79_vm0, %v1019_v42 }
 0x4bc   :  { %v274_v53 = vpack.c.bf16 %v273_v52, %v273_v52  ;;  %148 = vmatprep.mubr.bf16.mxu0 %v1097_v1 }
 0x4be   :  { %276 = vrot.lane.b32.xlu1 %v274_v53, %s1101_s12 }
 0x530   :  { %v277_v58 = vpop.permute.xlu1 %276 }
 0x531   :  { %948 = vmatmul.mubr.msk.bf16.vlgmr.msra.gmra.mrb[4].mxu1 %vm200_vm3, %v277_v58 }
 0x532   :  { %952 = vmatpush3.bf16.msra.mxu1 %v1176_v24  ;;  %955 = vmatprep.mubr.msk.bf16.mxu1 %vm1100_vm2, %v1099_v23 }
 0x533   :  { %953 = vmatprep.subr.bf16.mxu1 %v1099_v23 }
 0x536   :  { %954 = vmatpush3.bf16.msra.mxu1 %v1185_v25 }
 0x537   :  { %959 = vmatprep.subr.bf16.mxu1 %v1099_v23 }
 0x58e   :  { %v142_v47 = vpop.f32.mrb[8].mxu0 }
 0x58f   :  { %v143_v1 = vadd.f32 %v142_v47, %v1163_v8 }
 0x604   :  { %v315_v60 = vpop.f32.mrb[4].mxu1 }
 0x605   :  { %v321_v61 = vadd.f32 %v315_v60, %v135_v59  ;;  %v949_v62 = vpop.f32.mrb[5].mxu1 }
 0x606   :  { %v318_v63 = vpop.f32.mrb[6].mxu1 }
 0x607   :  { %v889_v0 = vmul.f32 -1.442695, %v321_v61  ;;  %v950_v2 = vpop.f32.mrb[7].mxu1 }
 0x609   :  { %1041 = vpow2.f32 %v889_v0 }
 0x60a   :  { %1043 = vtanh.f32 %v321_v61 }
 0x613   :  { %v1042_v3 = vpop.eup %1041 }
 0x614   :  { %v325_v4 = vadd.f32 1.0, %v1042_v3  ;;  %v1044_v6 = vpop.eup %1043 }
 0x616   :  { %1045 = vrcp.f32 %v325_v4 }
 0x620   :  { %v1046_v9 = vpop.eup %1045 }
 0x621   :  { %v329_v10 = vsel %vm160_vm1, %v1046_v9, %v1044_v6  ;;  %v1020_v6 = vld [vmem:[%s1339_s0 + $0x18] sm:$0xff]  }
 0x622   :  { %331 = vrot.lane.b32.xlu0 %v329_v10, %s1098_s1  ;;  %v335_v13 = vmul.f32 %v329_v10, %v267_v48  ;;  %v144_v48 = vpop.f32.mrb[9].mxu0  ;;  %882 = vmatmul.mubr.msk.bf16.gmra.mrb[12].mxu0 %vm79_vm0, %v1020_v6 }
 0x623   :  { %v145_v49 = vpop.f32.mrb[10].mxu0  ;;  %971 = vmatprep.mubr.msk.bf16.mxu0 %vm1100_vm2, %v1099_v23 }
 0x624   :  { %v147_v50 = vpop.f32.mrb[11].mxu0 }
 0x694   :  { %v332_v11 = vpop.permute.xlu0 %331 }
 0x695   :  { %v334_v12 = vmul.f32 %v332_v11, %v329_v10 }
 0x697   :  { %337 = vrot.lane.b32.xlu1 %v334_v12, %s1098_s1 }
 0x709   :  { %v338_v14 = vpop.permute.xlu1 %337 }
 0x70a   :  { %v340_v15 = vadd.f32 %v338_v14, %v335_v13  ;;  %v150_v13 = vpop.f32.mrb[12].mxu0 }
 0x70b   :  { %v152_v14 = vpop.f32.mrb[13].mxu0  ;;  %v151_v42 = vadd.f32 %v150_v13, %v1163_v8 }
 0x70c   :  { %1047 = vtanh.f32 %v340_v15 }
 0x716   :  { %v1048_v16 = vpop.eup %1047 }
 0x717   :  { %343 = vrot.lane.b32.xlu0 %v1048_v16, %s1098_s1 }
 0x789   :  { %v344_v18 = vpop.permute.xlu0 %343 }
 0x78a   :  { %v346_v19 = vmul.f32 %v344_v18, %v329_v10 }
 0x78c   :  { %v347_v20 = vpack.c.bf16 %v346_v19, %v346_v19  ;;  %v146_v19 = vadd.f32 %v145_v49, %v1163_v8 }
 0x78e   :  { %349 = vrot.lane.b32.xlu1 %v347_v20, %s1101_s12 }
 0x800   :  { %v350_v21 = vpop.permute.xlu1 %349 }
 0x801   :  { %956 = vmatmul.mubr.msk.bf16.vlgmr.msra.gmra.mrb[8].mxu1 %vm200_vm3, %v350_v21 }
 0x802   :  { %960 = vmatpush3.bf16.msra.mxu1 %v1176_v24  ;;  %963 = vmatprep.mubr.msk.bf16.mxu1 %vm1100_vm2, %v1099_v23 }
 0x803   :  { %961 = vmatprep.subr.bf16.mxu1 %v1099_v23 }
 0x806   :  { %962 = vmatpush3.bf16.msra.mxu1 %v1185_v25 }
 0x807   :  { %975 = vmatprep.subr.bf16.mxu1 %v1099_v23 }
 0x8d4   :  { %v388_v26 = vpop.f32.mrb[8].mxu1 }
 0x8d5   :  { %v394_v27 = vadd.f32 %v388_v26, %v138_v22  ;;  %v957_v28 = vpop.f32.mrb[9].mxu1 }
 0x8d6   :  { %v391_v29 = vpop.f32.mrb[10].mxu1 }
 0x8d7   :  { %v891_v30 = vmul.f32 -1.442695, %v394_v27  ;;  %v958_v31 = vpop.f32.mrb[11].mxu1 }
 0x8d9   :  { %1049 = vpow2.f32 %v891_v30 }
 0x8da   :  { %1051 = vtanh.f32 %v394_v27 }
 0x8e3   :  { %v1050_v32 = vpop.eup %1049 }
 0x8e4   :  { %v398_v33 = vadd.f32 1.0, %v1050_v32  ;;  %v1052_v34 = vpop.eup %1051 }
 0x8e6   :  { %1053 = vrcp.f32 %v398_v33 }
 0x8f0   :  { %v1054_v35 = vpop.eup %1053 }
 0x8f1   :  { %v402_v36 = vsel %vm160_vm1, %v1054_v35, %v1052_v34 }
 0x8f2   :  { %404 = vrot.lane.b32.xlu0 %v402_v36, %s1098_s1  ;;  %v408_v39 = vmul.f32 %v402_v36, %v340_v15  ;;  %v1269_v15 = vpop.f32.mrb[14].mxu0 }
 0x8f3   :  { %v1271_v16 = vpop.f32.mrb[15].mxu0 }
 0x964   :  { %v405_v37 = vpop.permute.xlu0 %404 }
 0x965   :  { %v407_v38 = vmul.f32 %v405_v37, %v402_v36 }
 0x967   :  { %410 = vrot.lane.b32.xlu1 %v407_v38, %s1098_s1 }
 0x9d9   :  { %v411_v40 = vpop.permute.xlu1 %410 }
 0x9da   :  { %v413_v41 = vadd.f32 %v411_v40, %v408_v39 }
 0x9dc   :  { %1055 = vtanh.f32 %v413_v41 }
 0x9e6   :  { %v1056_v43 = vpop.eup %1055 }
 0x9e7   :  { %416 = vrot.lane.b32.xlu0 %v1056_v43, %s1098_s1 }
 0xa59   :  { %v417_v44 = vpop.permute.xlu0 %416 }
 0xa5a   :  { %v419_v45 = vmul.f32 %v417_v44, %v402_v36 }
 0xa5c   :  { %v420_v46 = vpack.c.bf16 %v419_v45, %v419_v45 }
 0xa5e   :  { %422 = vrot.lane.b32.xlu1 %v420_v46, %s1101_s12 }
 0xad0   :  { %v423_v51 = vpop.permute.xlu1 %422 }
 0xad1   :  { %964 = vmatmul.mubr.msk.bf16.vlgmr.msra.gmra.mrb[12].mxu1 %vm200_vm3, %v423_v51 }
 0xad2   :  { %976 = vmatpush3.bf16.msra.mxu1 %v1176_v24  ;;  %979 = vmatprep.mubr.msk.bf16.mxu1 %vm1100_vm2, %v1099_v23 }
 0xad3   :  { %977 = vmatprep.subr.bf16.mxu1 %v1099_v23 }
 0xad6   :  { %978 = vmatpush3.bf16.msra.mxu1 %v1185_v25 }
 0xad7   :  { %991 = vmatprep.subr.bf16.mxu1 %v1099_v23 }
 0xba4   :  { %v461_v52 = vpop.f32.mrb[12].mxu1 }
 0xba5   :  { %v467_v53 = vadd.f32 %v461_v52, %v143_v1  ;;  %v965_v54 = vpop.f32.mrb[13].mxu1 }
 0xba6   :  { %v464_v55 = vpop.f32.mrb[14].mxu1 }
 0xba7   :  { %v893_v56 = vmul.f32 -1.442695, %v467_v53  ;;  %v966_v57 = vpop.f32.mrb[15].mxu1 }
 0xba9   :  { %1057 = vpow2.f32 %v893_v56 }
 0xbaa   :  { %1059 = vtanh.f32 %v467_v53 }
 0xbb3   :  { %v1058_v58 = vpop.eup %1057 }
 0xbb4   :  { %v471_v59 = vadd.f32 1.0, %v1058_v58  ;;  %v1060_v60 = vpop.eup %1059 }
 0xbb6   :  { %1061 = vrcp.f32 %v471_v59 }
 0xbc0   :  { %v1062_v61 = vpop.eup %1061 }
 0xbc1   :  { %v475_v62 = vsel %vm160_vm1, %v1062_v61, %v1060_v60 }
 0xbc2   :  { %477 = vrot.lane.b32.xlu0 %v475_v62, %s1098_s1  ;;  %v481_v2 = vmul.f32 %v475_v62, %v413_v41 }
 0xc34   :  { %v478_v63 = vpop.permute.xlu0 %477 }
 0xc35   :  { %v480_v0 = vmul.f32 %v478_v63, %v475_v62  ;;  %v45_v63 = vsub.s32 1, %v1154_v5 }
 0xc37   :  { %483 = vrot.lane.b32.xlu1 %v480_v0, %s1098_s1  ;;  %v46_v0 = vrot.slane %v1160_v7, %v45_v63 }
 0xca9   :  { %v484_v3 = vpop.permute.xlu1 %483 }
 0xcaa   :  { %v486_v4 = vadd.f32 %v484_v3, %v481_v2  ;;  %v156_v2 = vadd.f32 %v1271_v16, %v46_v0  ;;  %v154_v3 = vadd.f32 %v1269_v15, %v1163_v8 }
 0xcac   :  { %1063 = vtanh.f32 %v486_v4 }
 0xcb6   :  { %v1064_v9 = vpop.eup %1063 }
 0xcb7   :  { %489 = vrot.lane.b32.xlu0 %v1064_v9, %s1098_s1 }
 0xd29   :  { %v490_v10 = vpop.permute.xlu0 %489 }
 0xd2a   :  { %v492_v11 = vmul.f32 %v490_v10, %v475_v62 }
 0xd2c   :  { %v493_v12 = vpack.c.bf16 %v492_v11, %v492_v11 }
 0xd2e   :  { %495 = vrot.lane.b32.xlu1 %v493_v12, %s1101_s12 }
 0xda0   :  { %v496_v18 = vpop.permute.xlu1 %495 }
 0xda1   :  { %972 = vmatmul.mubr.msk.bf16.vlgmr.msra.gmra.mrb[16].mxu0 %vm200_vm3, %v496_v18 }
 0xda2   :  { %984 = vmatpush3.bf16.msra.mxu0 %v1176_v24  ;;  %987 = vmatprep.mubr.msk.bf16.mxu0 %vm1100_vm2, %v1099_v23 }
 0xda3   :  { %985 = vmatprep.subr.bf16.mxu0 %v1099_v23 }
 0xda6   :  { %986 = vmatpush3.bf16.msra.mxu0 %v1185_v25 }
 0xda7   :  { %999 = vmatprep.subr.bf16.mxu0 %v1099_v23 }
 0xe74   :  { %v534_v20 = vpop.f32.mrb[16].mxu0 }
 0xe75   :  { %v540_v21 = vadd.f32 %v534_v20, %v146_v19  ;;  %v973_v22 = vpop.f32.mrb[17].mxu0 }
 0xe76   :  { %v537_v26 = vpop.f32.mrb[18].mxu0 }
 0xe77   :  { %v895_v27 = vmul.f32 -1.442695, %v540_v21  ;;  %v974_v28 = vpop.f32.mrb[19].mxu0 }
 0xe79   :  { %1065 = vpow2.f32 %v895_v27 }
 0xe7a   :  { %1067 = vtanh.f32 %v540_v21 }
 0xe83   :  { %v1066_v29 = vpop.eup %1065 }
 0xe84   :  { %v544_v24 = vadd.f32 1.0, %v1066_v29  ;;  %v1068_v30 = vpop.eup %1067 }
 0xe86   :  { %1069 = vrcp.f32 %v544_v24 }
 0xe90   :  { %v1070_v31 = vpop.eup %1069 }
 0xe91   :  { %v548_v25 = vsel %vm160_vm1, %v1070_v31, %v1068_v30  ;;  %v1021_v31 = vld [vmem:[%s1342_s5] sm:$0xff]  }
 0xe92   :  { %550 = vrot.lane.b32.xlu0 %v548_v25, %s1098_s1  ;;  %v554_v34 = vmul.f32 %v548_v25, %v486_v4  ;;  %v900_v4 = vmul.f32 -1.442695, %v156_v2 }
 0xf04   :  { %v551_v32 = vpop.permute.xlu0 %550 }
 0xf05   :  { %v553_v33 = vmul.f32 %v551_v32, %v548_v25  ;;  %v1023_v32 = vld [vmem:[%s1343_s4] sm:$0xff]  }
 0xf07   :  { %556 = vrot.lane.b32.xlu1 %v553_v33, %s1098_s1  ;;  %v1024_v33 = vld [vmem:[%s1343_s4 + $0x8] sm:$0xff]  }
 0xf79   :  { %v557_v35 = vpop.permute.xlu1 %556 }
 0xf7a   :  { %v559_v36 = vadd.f32 %v557_v35, %v554_v34 }
 0xf7c   :  { %1071 = vtanh.f32 %v559_v36 }
 0xf86   :  { %v1072_v37 = vpop.eup %1071 }
 0xf87   :  { %562 = vrot.lane.b32.xlu0 %v1072_v37, %s1098_s1 }
 0xff9   :  { %v563_v38 = vpop.permute.xlu0 %562 }
 0xffa   :  { %v565_v39 = vmul.f32 %v563_v38, %v548_v25  ;;  %v1022_v25 = vld [vmem:[%s1342_s5 + $0x8] sm:$0xff]  }
 0xffc   :  { %v566_v40 = vpack.c.bf16 %v565_v39, %v565_v39 }
 0xffe   :  { %568 = vrot.lane.b32.xlu1 %v566_v40, %s1101_s12 }
0x1070   :  { %v569_v41 = vpop.permute.xlu1 %568 }
0x1071   :  { %980 = vmatmul.mubr.msk.bf16.vlgmr.msra.gmra.mrb[16].mxu1 %vm200_vm3, %v569_v41 }
0x1072   :  { %995 = vmatprep.mubr.msk.bf16.mxu1 %vm1100_vm2, %v1099_v23  ;;  %992 = vmatpush3.bf16.msra.mxu1 %v1021_v31 }
0x1073   :  { %993 = vmatprep.subr.bf16.mxu1 %v1099_v23 }
0x1076   :  { %994 = vmatpush3.bf16.msra.mxu1 %v1022_v25 }
0x1144   :  { %v607_v43 = vpop.f32.mrb[16].mxu1 }
0x1145   :  { %v613_v44 = vadd.f32 %v607_v43, %v151_v42  ;;  %v981_v45 = vpop.f32.mrb[17].mxu1 }
0x1146   :  { %v610_v46 = vpop.f32.mrb[18].mxu1 }
0x1147   :  { %v897_v47 = vmul.f32 -1.442695, %v613_v44  ;;  %v982_v48 = vpop.f32.mrb[19].mxu1 }
0x1149   :  { %1073 = vpow2.f32 %v897_v47 }
0x114a   :  { %1075 = vtanh.f32 %v613_v44 }
0x1153   :  { %v1074_v49 = vpop.eup %1073 }
0x1154   :  { %v617_v50 = vadd.f32 1.0, %v1074_v49  ;;  %v1076_v51 = vpop.eup %1075  ;;  %v907_v49 = vld [vmem:[%s1344_s6] ss:$0 sm:$0xff] }
0x1156   :  { %1077 = vrcp.f32 %v617_v50 }
0x1160   :  { %v1078_v1 = vpop.eup %1077 }
0x1161   :  { %v621_v52 = vsel %vm160_vm1, %v1078_v1, %v1076_v51 }
0x1162   :  { %623 = vrot.lane.b32.xlu0 %v621_v52, %s1098_s1  ;;  %v627_v55 = vmul.f32 %v621_v52, %v559_v36 }
0x11d4   :  { %v624_v53 = vpop.permute.xlu0 %623 }
0x11d5   :  { %v626_v54 = vmul.f32 %v624_v53, %v621_v52 }
0x11d7   :  { %629 = vrot.lane.b32.xlu1 %v626_v54, %s1098_s1 }
0x1249   :  { %v630_v56 = vpop.permute.xlu1 %629 }
0x124a   :  { %v632_v57 = vadd.f32 %v630_v56, %v627_v55 }
0x124c   :  { %1079 = vtanh.f32 %v632_v57 }
0x124d   :  { %1081 = vpow2.f32 %v900_v4 }
0x1256   :  { %v1080_v58 = vpop.eup %1079 }
0x1257   :  { %635 = vrot.lane.b32.xlu0 %v1080_v58, %s1098_s1  ;;  %v1082_v14 = vpop.eup %1081 }
0x1258   :  { %v715_v19 = vadd.f32 1.0, %v1082_v14 }
0x12c9   :  { %v636_v59 = vpop.permute.xlu0 %635 }
0x12ca   :  { %v638_v60 = vmul.f32 %v636_v59, %v621_v52 }
0x12cc   :  { %v639_v61 = vpack.c.bf16 %v638_v60, %v638_v60 }
0x12ce   :  { %641 = vrot.lane.b32.xlu1 %v639_v61, %s1101_s12 }
0x1340   :  { %v642_v62 = vpop.permute.xlu1 %641 }
0x1341   :  { %988 = vmatmul.mubr.msk.bf16.vlgmr.msra.gmra.mrb[20].mxu0 %vm200_vm3, %v642_v62 }
0x1342   :  { %1003 = vmatprep.mubr.msk.bf16.mxu0 %vm1100_vm2, %v1099_v23  ;;  %1000 = vmatpush3.bf16.msra.mxu0 %v1023_v32 }
0x1343   :  { %1001 = vmatprep.subr.bf16.mxu0 %v1099_v23 }
0x1346   :  { %1002 = vmatpush3.bf16.msra.mxu0 %v1024_v33 }
0x1414   :  { %v680_v6 = vpop.f32.mrb[20].mxu0 }
0x1415   :  { %v686_v9 = vadd.f32 %v680_v6, %v154_v3  ;;  %v989_v10 = vpop.f32.mrb[21].mxu0 }
0x1416   :  { %v683_v11 = vpop.f32.mrb[22].mxu0 }
0x1417   :  { %v899_v12 = vmul.f32 -1.442695, %v686_v9  ;;  %v990_v13 = vpop.f32.mrb[23].mxu0 }
0x1419   :  { %1083 = vpow2.f32 %v899_v12 }
0x141a   :  { %1085 = vtanh.f32 %v686_v9 }
0x1423   :  { %v1084_v18 = vpop.eup %1083 }
0x1424   :  { %v690_v5 = vadd.f32 1.0, %v1084_v18  ;;  %v1086_v7 = vpop.eup %1085 }
0x1426   :  { %1087 = vrcp.f32 %v690_v5 }
0x1427   :  { %1089 = vtanh.f32 %v156_v2 }
0x1428   :  { %1091 = vrcp.f32 %v715_v19 }
0x1430   :  { %v1088_v16 = vpop.eup %1087 }
0x1431   :  { %v1090_v8 = vpop.eup %1089  ;;  %v694_v15 = vsel %vm160_vm1, %v1088_v16, %v1086_v7 }
0x1432   :  { %v1092_v20 = vpop.eup %1091  ;;  %696 = vrot.lane.b32.xlu0 %v694_v15, %s1098_s1  ;;  %v700_v24 = vmul.f32 %v694_v15, %v632_v57 }
0x1433   :  { %v719_v21 = vsel %vm160_vm1, %v1092_v20, %v1090_v8 }
0x1436   :  { %721 = vrot.lane.b32.xlu0 %v719_v21, %s1098_s1 }
0x14a4   :  { %v697_v22 = vpop.permute.xlu0 %696 }
0x14a5   :  { %v699_v26 = vmul.f32 %v697_v22, %v694_v15 }
0x14a7   :  { %702 = vrot.lane.b32.xlu1 %v699_v26, %s1098_s1 }
0x14a8   :  { %v722_v27 = vpop.permute.xlu0 %721 }
0x14a9   :  { %v724_v28 = vmul.f32 %v722_v27, %v719_v21 }
0x14ab   :  { %1093 = vtanh.f32 %v724_v28 }
0x14b5   :  { %v1094_v29 = vpop.eup %1093 }
0x14b6   :  { %727 = vrot.lane.b32.xlu0 %v1094_v29, %s1101_s12 }
0x1519   :  { %v703_v30 = vpop.permute.xlu1 %702 }
0x151a   :  { %v705_v17 = vadd.f32 %v703_v30, %v700_v24 }
0x151c   :  { %1095 = vtanh.f32 %v705_v17 }
0x1526   :  { %v1096_v34 = vpop.eup %1095 }
0x1527   :  { %708 = vrot.lane.b32.xlu1 %v1096_v34, %s1098_s1 }
0x1528   :  { %v728_v35 = vpop.permute.xlu0 %727 }
0x1529   :  { %v730_v36 = vmul.f32 %v728_v35, %v719_v21 }
0x152b   :  { %v737_v37 = vmax.f32 %v730_v36, 0.0 }
0x152d   :  { %v738_v38 = vpack.c.bf16 %v737_v37, %v737_v37 }
0x152f   :  { %744 = vrot.lane.b32.xlu1 %v738_v38, %s1101_s12 }
0x1599   :  { %v709_v39 = vpop.permute.xlu1 %708 }
0x159a   :  { %v711_v40 = vmul.f32 %v709_v39, %v694_v15 }
0x159c   :  { %v731_v41 = vmax.f32 %v711_v40, 0.0 }
0x159e   :  { %v732_v42 = vpack.c.bf16 %v731_v41, %v731_v41 }
0x15a0   :  { %802 = vrot.lane.b32.xlu0 %v732_v42, %s1101_s12 }
0x15a1   :  { %v745_v43 = vpop.permute.xlu1 %744 }
0x15a2   :  { %996 = vmatmul.mubr.msk.bf16.vlgmr.msra.gmra.mrb[20].mxu1 %vm200_vm3, %v745_v43 }
0x1612   :  { %v803_v44 = vpop.permute.xlu0 %802 }
0x1613   :  { %1004 = vmatmul.mubr.msk.bf16.vlgmr.msra.gmra.mrb[24].mxu0 %vm200_vm3, %v803_v44 }
0x1675   :  { %v795_v23 = vpop.f32.mrb[20].mxu1 }
0x1676   :  { %v997_v45 = vpop.f32.mrb[21].mxu1 }
0x1677   :  { %v798_v46 = vpop.f32.mrb[22].mxu1 }
0x1678   :  { %v998_v47 = vpop.f32.mrb[23].mxu1 }
0x16e6   :  { %v853_v48 = vpop.f32.mrb[24].mxu0 }
0x16e7   :  { %v854_v50 = vadd.f32 %v853_v48, %v795_v23  ;;  %v1005_v51 = vpop.f32.mrb[25].mxu0 }
0x16e8   :  { %v856_v1 = vpop.f32.mrb[26].mxu0 }
0x16e9   :  { %v866_v52 = vadd.f32 %v907_v49, %v854_v50  ;;  %v1006_v53 = vpop.f32.mrb[27].mxu0 }
0x16eb   :  { %868 = vst.msk [vmem:[%s1345_s7] sm:$0xff] %vm867_vm4, %v866_v52 }

</bundles_post_ra>
